<compile_context>
chip_gen: v6e
topology: v6e:2x2x1
jax: 0.10.0
libtpu: 0.0.40
codegen_flags: <defaults>
</compile_context>

<pallas_src>
import functools

import jax
import jax.numpy as jnp
from jax.experimental import pallas as pl
from jax.experimental.pallas import tpu as pltpu


def _round_up(a, b):
    return (a + b - 1) // b * b


_SQRT_2_OVER_PI = 0.7978845608028654
_GELU_C1 = 0.044715
_INV_SQRT2 = 0.7071067811865476


def _gelu(h, approximate):
    """GELU in h.dtype. approximate=True -> tanh form (EUP), False -> exact erf."""
    dt = h.dtype
    half = jnp.asarray(0.5, dt)
    one = jnp.asarray(1.0, dt)
    if approximate:
        c0 = jnp.asarray(_SQRT_2_OVER_PI, dt)
        c1 = jnp.asarray(_GELU_C1, dt)
        t = jnp.tanh(c0 * (h + c1 * h * h * h))
        return half * h * (one + t)
    inv_sqrt2 = jnp.asarray(_INV_SQRT2, dt)
    return half * h * (one + jax.lax.erf(h * inv_sqrt2))


def _dualfunc_kernel(x_ref, w1t_ref, b1_ref, w2t_ref, b2_ref, o_ref, *,
                     nb, compute_dtype, elementwise_dtype, approximate_gelu):
    # x_ref/o_ref: (nb, C, tl) -- channels on sublanes, spatial on lanes
    w1t = w1t_ref[...]          # (Hd, C)
    w2t = w2t_ref[...]          # (C, Hd)
    b1 = b1_ref[...]            # (Hd, 1)  lane-broadcast bias
    b2 = b2_ref[...]            # (C, 1)

    for b in range(nb):         # small static unroll over the batch sub-block
        x = x_ref[b]            # (C, tl)
        x_f32 = x.astype(jnp.float32)

        # fn1: pointwise conv == (Hd, C) @ (C, tl) matmul on the MXU
        # (big dimension tl sits on the MXU-N / lane axis -> lane-dense).
        h = jnp.dot(w1t, x.astype(compute_dtype),
                    preferred_element_type=jnp.float32)
        h = h + b1

        # GELU (tanh form by default -> EUP transcendental slot).
        h = _gelu(h.astype(elementwise_dtype), approximate_gelu)
        h = h.astype(compute_dtype)

        # fn2: pointwise conv back to C channels: (C, Hd) @ (Hd, tl)
        y = jnp.dot(w2t, h, preferred_element_type=jnp.float32) + b2

        # residual add (DualFunc semantics), lane-dense store
        o_ref[b] = (y + x_f32).astype(o_ref.dtype)


def _choose_tiling(N, HW, *, tl_max, nb_max, min_grid_steps):
    """Pick (nb, tl): big tiles for DMA efficiency, but keep enough grid steps
    on the 'parallel' axes so v7x's two TensorCores both get work."""
    tl = max(128, min(tl_max, _round_up(HW, 128)))
    nb = max(1, min(nb_max, N))

    def steps(nb_, tl_):
        return pl.cdiv(N, nb_) * pl.cdiv(HW, tl_)

    while steps(nb, tl) < min_grid_steps and (tl > 512 or nb > 1):
        if tl > 512:
            tl = _round_up(tl // 2, 128)
        else:
            nb = max(1, nb // 2)
    return nb, tl


def dualfunc_forward(x_nchw, w1, b1, w2, b2, *, tl_max=16384, nb_max=4,
                     min_grid_steps=8, compute_dtype=jnp.float32,
                     elementwise_dtype=jnp.float32, approximate_gelu=True):
    """x_nchw: (N, C, H, W) float32. w1: (C, Hd), b1: (Hd,), w2: (Hd, C), b2: (C,).
    Returns (N, C, H, W) = w2.T @ gelu(w1.T @ x + b1) + b2 + x (per spatial pos)."""
    N, C, H, W = x_nchw.shape
    Hd = w1.shape[1]
    HW = H * W

    # NCHW-native: only a free reshape, no transposes, no pad, no output slice.
    x3 = x_nchw.reshape(N, C, HW)

    nb, tl = _choose_tiling(N, HW, tl_max=tl_max, nb_max=nb_max,
                            min_grid_steps=min_grid_steps)

    # Transposed weights (tiny) + biases as column vectors so both matmuls put
    # the big dimension (tl) on the lane axis.
    w1t = jnp.asarray(w1.T, dtype=compute_dtype)          # (Hd, C)
    w2t = jnp.asarray(w2.T, dtype=compute_dtype)          # (C, Hd)
    b1c = b1.reshape(Hd, 1).astype(jnp.float32)
    b2c = b2.reshape(C, 1).astype(jnp.float32)

    # Ragged last blocks (HW % tl != 0 or N % nb != 0) are handled by Pallas
    # partial-block masking: OOB input lanes are unused garbage, OOB output
    # writes are dropped -> no wrapper pad / slice HBM round trips.
    grid = (pl.cdiv(N, nb), pl.cdiv(HW, tl))

    # Scoped-VMEM budget from actual footprint (double-buffered x/out tiles +
    # the (nb, Hd, tl) f32 intermediate), with 2x margin, clamped so the same
    # kernel fits v7x's 64 MiB physical VMEM.
    x_tile_bytes = nb * C * tl * 4
    h_bytes = nb * Hd * tl * 4
    w_bytes = (2 * Hd * C + Hd + C) * 4
    footprint = 2 * (2 * x_tile_bytes) + h_bytes + w_bytes
    vmem_limit = int(min(48 << 20, max(24 << 20, 2 * footprint + (4 << 20))))

    kernel = functools.partial(
        _dualfunc_kernel, nb=nb, compute_dtype=compute_dtype,
        elementwise_dtype=elementwise_dtype, approximate_gelu=approximate_gelu)

    out3 = pl.pallas_call(
        kernel,
        out_shape=jax.ShapeDtypeStruct((N, C, HW), x_nchw.dtype),
        grid_spec=pltpu.PrefetchScalarGridSpec(
            num_scalar_prefetch=0,
            grid=grid,
            in_specs=[
                pl.BlockSpec((nb, C, tl), lambda i, j: (i, 0, j)),  # x tile
                pl.BlockSpec((Hd, C), lambda i, j: (0, 0)),         # w1^T (full)
                pl.BlockSpec((Hd, 1), lambda i, j: (0, 0)),         # b1 col
                pl.BlockSpec((C, Hd), lambda i, j: (0, 0)),         # w2^T (full)
                pl.BlockSpec((C, 1), lambda i, j: (0, 0)),          # b2 col
            ],
            out_specs=pl.BlockSpec((nb, C, tl), lambda i, j: (i, 0, j)),
        ),
        compiler_params=pltpu.CompilerParams(
            dimension_semantics=("parallel", "parallel"),
            vmem_limit_bytes=vmem_limit,
        ),
    )(x3, w1t, b1c, w2t, b2c)

    return out3.reshape(N, C, H, W)


def _reference(x_nchw, w1, b1, w2, b2, approximate_gelu=True):
    # Pure-JAX reference of fn2(fn1(x)) + x with the same fn1/fn2 (f32).
    N, C, H, W = x_nchw.shape
    xf = jnp.transpose(x_nchw, (0, 2, 3, 1)).reshape(-1, C)
    h = xf @ w1 + b1
    h = _gelu(h, approximate_gelu)
    y = h @ w2 + b2 + xf
    return jnp.transpose(y.reshape(N, H, W, C), (0, 3, 1, 2))


if __name__ == "__main__":
    key = jax.random.PRNGKey(0)
    k_x, k_w1, k_b1, k_w2, k_b2 = jax.random.split(key, 5)

    N, C, H, W = 2, 4, 16, 16
    HIDDEN = 4 * C  # fn1 expands channels 4x, fn2 projects back

    x = jax.random.normal(k_x, (N, C, H, W), dtype=jnp.float32)
    w1 = jax.random.normal(k_w1, (C, HIDDEN), dtype=jnp.float32) * 0.1
    b1 = jax.random.normal(k_b1, (HIDDEN,), dtype=jnp.float32) * 0.01
    w2 = jax.random.normal(k_w2, (HIDDEN, C), dtype=jnp.float32) * 0.1
    b2 = jax.random.normal(k_b2, (C,), dtype=jnp.float32) * 0.01

    out = dualfunc_forward(x, w1, b1, w2, b2)
    out = jax.block_until_ready(out)

    ref = _reference(x, w1, b1, w2, b2)
    assert out.shape == x.shape
    # tanh-GELU in-kernel (EUP) vs XLA tanh outside can differ at ~1e-6; keep a
    # slightly looser tolerance than the erf/erf comparison used previously.
    assert jnp.allclose(out, ref, atol=1e-3, rtol=1e-3), "mismatch vs reference"

    # TODO(synk): the tiny __main__ shape is a correctness smoke test only;
    # benchmark on real mixmobilenet shapes with xprof (min of N), not wall-clock.
    print("KERNEL_OK")
</pallas_src>

<mosaic_0001>
module attributes {stable_mosaic.version = 11 : i64} {
  func.func @_dualfunc_kernel(%arg0: i32, %arg1: i32, %arg2: memref<1x4x256xf32, #tpu.memory_space<vmem>>, %arg3: memref<16x4xf32, #tpu.memory_space<vmem>>, %arg4: memref<16x1xf32, #tpu.memory_space<vmem>>, %arg5: memref<4x16xf32, #tpu.memory_space<vmem>>, %arg6: memref<4x1xf32, #tpu.memory_space<vmem>>, %arg7: memref<1x4x256xf32, #tpu.memory_space<vmem>>) attributes {dimension_semantics = [#tpu.dimension_semantics<parallel>, #tpu.dimension_semantics<parallel>], iteration_bounds = array<i64: 2, 1>, scalar_prefetch = 0 : i64, scratch_operands = 0 : i64, tpu.core_type = #tpu.core_type<tc>, window_params = [{transform_indices = @transform_0, window_bounds = array<i64: 1, 4, 256>}, {pipeline_mode = #tpu.pipeline_mode<synchronous>, transform_indices = @transform_1, window_bounds = array<i64: 16, 4>}, {pipeline_mode = #tpu.pipeline_mode<synchronous>, transform_indices = @transform_2, window_bounds = array<i64: 16, 1>}, {pipeline_mode = #tpu.pipeline_mode<synchronous>, transform_indices = @transform_3, window_bounds = array<i64: 4, 16>}, {pipeline_mode = #tpu.pipeline_mode<synchronous>, transform_indices = @transform_4, window_bounds = array<i64: 4, 1>}, {transform_indices = @transform_5, window_bounds = array<i64: 1, 4, 256>}]} {
    %c0 = arith.constant 0 : index
    %c0_0 = arith.constant 0 : index
    %0 = vector.load %arg3[%c0, %c0_0] : memref<16x4xf32, #tpu.memory_space<vmem>>, vector<16x4xf32>
    %c0_1 = arith.constant 0 : index
    %c0_2 = arith.constant 0 : index
    %1 = vector.load %arg5[%c0_1, %c0_2] : memref<4x16xf32, #tpu.memory_space<vmem>>, vector<4x16xf32>
    %c0_3 = arith.constant 0 : index
    %c0_4 = arith.constant 0 : index
    %2 = vector.load %arg4[%c0_3, %c0_4] : memref<16x1xf32, #tpu.memory_space<vmem>>, vector<16x1xf32>
    %c0_5 = arith.constant 0 : index
    %c0_6 = arith.constant 0 : index
    %3 = vector.load %arg6[%c0_5, %c0_6] : memref<4x1xf32, #tpu.memory_space<vmem>>, vector<4x1xf32>
    %c0_7 = arith.constant 0 : index
    %c0_8 = arith.constant 0 : index
    %c0_9 = arith.constant 0 : index
    %4 = vector.load %arg2[%c0_7, %c0_8, %c0_9] : memref<1x4x256xf32, #tpu.memory_space<vmem>>, vector<1x4x256xf32>
    %5 = vector.shape_cast %4 : vector<1x4x256xf32> to vector<4x256xf32>
    %cst = arith.constant dense<0.000000e+00> : vector<16x256xf32>
    %6 = tpu.matmul %0, %5, %cst {dimension_numbers = #tpu.dot_dimension_numbers<[1], [0], [0], [1], [0, 0, 1, 1], [], []>} : vector<16x4xf32>, vector<4x256xf32>, vector<16x256xf32> -> vector<16x256xf32>
    %7 = vector.broadcast %2 : vector<16x1xf32> to vector<16x256xf32>
    %8 = arith.addf %6, %7 : vector<16x256xf32>
    %cst_10 = arith.constant 4.471500e-02 : f32
    %9 = vector.broadcast %cst_10 : f32 to vector<16x256xf32>
    %10 = arith.mulf %9, %8 : vector<16x256xf32>
    %11 = arith.mulf %10, %8 : vector<16x256xf32>
    %12 = arith.mulf %11, %8 : vector<16x256xf32>
    %13 = arith.addf %8, %12 : vector<16x256xf32>
    %cst_11 = arith.constant 0.797884583 : f32
    %14 = vector.broadcast %cst_11 : f32 to vector<16x256xf32>
    %15 = arith.mulf %14, %13 : vector<16x256xf32>
    %16 = math.tanh %15 : vector<16x256xf32>
    %cst_12 = arith.constant 5.000000e-01 : f32
    %17 = vector.broadcast %cst_12 : f32 to vector<16x256xf32>
    %18 = arith.mulf %17, %8 : vector<16x256xf32>
    %cst_13 = arith.constant 1.000000e+00 : f32
    %19 = vector.broadcast %cst_13 : f32 to vector<16x256xf32>
    %20 = arith.addf %19, %16 : vector<16x256xf32>
    %21 = arith.mulf %18, %20 : vector<16x256xf32>
    %cst_14 = arith.constant dense<0.000000e+00> : vector<4x256xf32>
    %22 = tpu.matmul %1, %21, %cst_14 {dimension_numbers = #tpu.dot_dimension_numbers<[1], [0], [0], [1], [0, 0, 1, 1], [], []>} : vector<4x16xf32>, vector<16x256xf32>, vector<4x256xf32> -> vector<4x256xf32>
    %23 = vector.broadcast %3 : vector<4x1xf32> to vector<4x256xf32>
    %24 = arith.addf %22, %23 : vector<4x256xf32>
    %25 = arith.addf %24, %5 : vector<4x256xf32>
    %c0_15 = arith.constant 0 : index
    %c0_16 = arith.constant 0 : index
    %c0_17 = arith.constant 0 : index
    %26 = vector.load %arg7[%c0_15, %c0_16, %c0_17] : memref<1x4x256xf32, #tpu.memory_space<vmem>>, vector<1x4x256xf32>
    %27 = vector.shape_cast %26 : vector<1x4x256xf32> to vector<4x256xf32>
    %28 = vector.shape_cast %25 : vector<4x256xf32> to vector<1x4x256xf32>
    tpu.vector_store %arg7[%c0_15, %c0_16, %c0_17], %28 {strides = array<i32>} : memref<1x4x256xf32, #tpu.memory_space<vmem>>, vector<1x4x256xf32>,
    return
  }
  func.func @transform_0(%arg0: i32, %arg1: i32) -> (i32, i32, i32) {
    %c0_i32 = arith.constant 0 : i32
    %c0_i32_0 = arith.constant 0 : i32
    return %arg0, %c0_i32, %arg1 : i32, i32, i32
  }
  func.func @transform_1(%arg0: i32, %arg1: i32) -> (i32, i32) {
    %c0_i32 = arith.constant 0 : i32
    %c0_i32_0 = arith.constant 0 : i32
    %c0_i32_1 = arith.constant 0 : i32
    return %c0_i32, %c0_i32_0 : i32, i32
  }
  func.func @transform_2(%arg0: i32, %arg1: i32) -> (i32, i32) {
    %c0_i32 = arith.constant 0 : i32
    %c0_i32_0 = arith.constant 0 : i32
    %c0_i32_1 = arith.constant 0 : i32
    return %c0_i32, %c0_i32_0 : i32, i32
  }
  func.func @transform_3(%arg0: i32, %arg1: i32) -> (i32, i32) {
    %c0_i32 = arith.constant 0 : i32
    %c0_i32_0 = arith.constant 0 : i32
    %c0_i32_1 = arith.constant 0 : i32
    return %c0_i32, %c0_i32_0 : i32, i32
  }
  func.func @transform_4(%arg0: i32, %arg1: i32) -> (i32, i32) {
    %c0_i32 = arith.constant 0 : i32
    %c0_i32_0 = arith.constant 0 : i32
    %c0_i32_1 = arith.constant 0 : i32
    return %c0_i32, %c0_i32_0 : i32, i32
  }
  func.func @transform_5(%arg0: i32, %arg1: i32) -> (i32, i32, i32) {
    %c0_i32 = arith.constant 0 : i32
    %c0_i32_0 = arith.constant 0 : i32
    return %arg0, %c0_i32, %arg1 : i32, i32, i32
  }
}

</mosaic_0001>

<bundles_post_ra>
// kernel: tpu_custom_call.1
= control target key start
LH: loop header
LB: loop body
LE: loop exit
PB: predicated region body
PF: predicated region fallthrough
CT: control target
= control target key end

     0   :  { %10 = vsyncpa [#allocation3], 0  ;;  %s905_s0 = inlined_call_operand.vmem [shape: f32[2,4,256], index: 0, kind: input, shape index: {}]   ;;  %s906_s1 = inlined_call_operand.vmem [shape: f32[16,4], index: 1, kind: input, shape index: {}]   ;;  %s907_s2 = inlined_call_operand.vmem [shape: f32[16,1], index: 2, kind: input, shape index: {}]   ;;  %s908_s3 = inlined_call_operand.vmem [shape: f32[4,16], index: 3, kind: input, shape index: {}]   ;;  %s909_s4 = inlined_call_operand.vmem [shape: f32[4,1], index: 4, kind: input, shape index: {}]   ;;  %s910_s5 = inlined_call_operand.hbm [shape: f32[2,4,256], index: 5, kind: output, shape index: {}]  }
   0x1   :  { %12 = vsyncpa [#allocation3 + $0x1], 0  ;;  %s778_s18 = smov 0   ;;  %s780_s19 = smov 0  }
   0x2   :  { %s782_s20 = smov 0   ;;  %s784_s21 = smov 0  }
   0x3   :  { %s786_s22 = smov 0   ;;  %s788_s23 = smov 0  }
   0x4 LB: > { %s579_s24 = sadd.s32 4294967295, %s743_s23   ;;  %s580_s25 = sadd.s32 4294967294, %s743_s23   ;;  %s743_s23 = sphi %s788_s23, %s18_s23   ;;  %s739_s22 = sphi %s786_s22, %s917_s22   ;;  %s735_s21 = sphi %s784_s21, %s916_s21   ;;  %s731_s20 = sphi %s782_s20, %s915_s20   ;;  %s727_s19 = sphi %s780_s19, %s914_s19   ;;  %s723_s18 = sphi %s778_s18, %s913_s18  }
   0x5   : > { %s30_s26 = sadd.s32 1, %s739_s22  ;;  %s151_s27 = sadd.s32 1, %s731_s20 }
   0x6   : > { %p32_p0 = scmp.ge.s32.totalorder %s30_s26, 2  ;;  %p161_p1 = scmp.ne.s32.totalorder %s731_s20, %s727_s19 }
   0x7   : > { %p162_p2 = scmp.eq.s32.totalorder %s579_s24, 1  ;;  %p167_p3 = scmp.ne.s32.totalorder %s727_s19, %s723_s18 }
   0x8   : > { %s919_s26 = smov (%p32_p0, %s30_s26), 0  ;;  %p168_p5 = scmp.eq.s32.totalorder %s580_s25, 1 }
   0x9   : > { %p818_p4 = por %p162_p2, %p161_p1  ;;  %s146_s29 = ssub.s32 %s739_s22, %s919_s26 }
   0xa   : > { %p583_p6 = scmp.ge.s32.totalorder %s743_s23, 1  ;;  %p149_p7 = scmp.eq.s32.totalorder %s146_s29, 0 }
   0xb   : > { %p825_p8 = por %p168_p5, %p167_p3  ;;  %p211_p9 = scmp.lt.s32.totalorder %s743_s23, 3 }
   0xc   : > { %s831_s6 = scalar_select %p149_p7, %s731_s20, %s151_s27  }
   0xd   : > { %p212_p10 = pnand %p583_p6, %p211_p9 }
   0xe   : > { %p244_p11 = scmp.lt.s32.totalorder (!%p212_p10), %s735_s21, 1  ;;  %s598_s11 = sshll.u32 (!%p212_p10), %s735_s21, 7 }
   0xf   : > { %215 = sbr.rel (%p212_p10) target bundleno = 476 (0x1dc), region = 40  ;;  %s501_s16 = scalar_lea.hbm (!%p212_p10), %s910_s5, %s598_s11 }
  0x14   : > { %v745_v0 = vmov 0.0   ;;  %v258_v1 = vld [vmem:[%s907_s2 + $0x8] sm:$0xff]  ;;  %s245_s9 = scalar_select %p244_p11, %s735_s21, 1  ;;  %v746_v2 = vmov 0   ;;  %v257_v3 = vld [vmem:[%s907_s2] sm:$0xff]  ;;  %vm280_vm0 = vcmask 1043456  }
  0x15   : > { %349 = vmatprep.mubr.f32.mxu0 %v745_v0  ;;  %471 = vmatprep.mubr.f32.mxu1 %v745_v0  ;;  %v254_v6 = vld [vmem:[%s906_s1] sm:$0xff]  ;;  %vm273_vm1 = vcmask 31744   ;;  %v255_v7 = vld [vmem:[%s906_s1 + $0x8] sm:$0xff]  ;;  %vm403_vm2 = vcmask 130048   ;;  %s747_s21 = smov [#allocation2]  }
  0x16   : > { %656 = vset.pattern.permute.xlu0 %v746_v2  ;;  %657 = vset.pattern.permute.xlu1 %v746_v2  ;;  %s597_s10 = sshll.u32 %s245_s9, 3  ;;  %v259_v8 = vld [vmem:[%s909_s4] sm:$0xf]  ;;  %s240_s9 = sand.u32 1, %s727_s19  }
  0x17   : > { %268 = vperm.xlu0 %656, %v258_v1   ;;  %s251_s15 = scalar_lea.vmem %s905_s0, %s597_s10  ;;  %400 = vperm.xlu1 %657, %v259_v8   ;;  %v256_v55 = vld [vmem:[%s908_s3] sm:$0xf]  ;;  %s584_s10 = sshll.u32 %s240_s9, 3 }
  0x18   : > { %v844_v4 = vld [vmem:[%s251_s15] sm:$0xff]  ;;  %s242_s12 = scalar_lea.vmem [#allocation2], %s584_s10  ;;  %s487_s17 = scalar_lea.sflag [#allocation3], %s240_s9 }
  0x19   : > { %v848_v5 = vcombine.high %v844_v4, %v844_v4  ;;  %s503_s13 = sshll.u32 %s242_s12, 4  ;;  %s671_s25 = sshll.u32 %s747_s21, 4  ;;  %s504_s13 = int_to_ptr.vmem [resolvable:$true] %s503_s13  ;;  %s672_s25 = int_to_ptr.vmem [resolvable:$false] %s671_s25 }
  0x1a   : > { %s667_s24 = scalar_lea.vmem %s504_s13, 128  ;;  %s673_s27 = scalar_lea.vmem %s672_s25, 256 }
  0x1b   : > { %263 = vperm.xlu0 %656, %v257_v3   ;;  %587 = vmatprep.subr.msk.mxu0 %vm280_vm0, %v848_v5  ;;  %p668_p12 = scmp.ne.s32.totalorder %s504_s13, %s667_s24  ;;  %p674_p1 = scmp.lt.s32.totalorder %s504_s13, %s672_s25 }
  0x1c   : > { %588 = vmatpush1.msk.msra.mxu0 %vm280_vm0, %v844_v4  ;;  %p675_p2 = scmp.lt.s32.totalorder %s673_s27, %s667_s24 }
  0x1d   : > { %589 = vmatmul.mubr.msk.f32.vlgmr.msra.gmra.mxu0 %vm273_vm1, %v254_v6  ;;  %p669_p13 = pnand %p668_p12, %p818_p4 }
  0x1e   : > { %355 = vmatprep.mubr.f32.mxu0 %v745_v0  ;;  %p676_p3 = por %p675_p2, %p674_p1 }
  0x1f   : > { %p670_p0 = pneg %p669_p13 }
  0x21   : > { %590 = vmatmul.mubr.msk.f32.gmra.mxu0 %vm273_vm1, %v255_v7  ;;  %p677_p5 = pnand %p676_p3, %p670_p0 }
  0x92   : > { %v269_v9 = vpop.permute.xlu0 %268  ;;  %v401_v56 = vpop.permute.xlu1 %400 }
  0x96   : > { %v264_v10 = vpop.permute.xlu0 %263 }
  0xdd   : > { %v351_v11 = vpop.f32.mrf.mxu0 }
  0xde   : > { %v352_v12 = vadd.f32 %v351_v11, %v264_v10 }
  0xdf   : > { %v353_v13 = vpop.f32.mrf.mxu0 }
  0xe0   : > { %v362_v14 = vmul.f32 0.044715, %v352_v12  ;;  %v354_v15 = vadd.f32 %v353_v13, %v264_v10  ;;  %v386_v52 = vmul.f32 0.5, %v352_v12 }
  0xe1   : > { %v357_v16 = vpop.f32.mrf.mxu0 }
  0xe2   : > { %v366_v17 = vmul.f32 %v362_v14, %v352_v12  ;;  %v363_v18 = vmul.f32 0.044715, %v354_v15  ;;  %v358_v19 = vadd.f32 %v357_v16, %v269_v9  ;;  %v387_v50 = vmul.f32 0.5, %v354_v15 }
  0xe3   : > { %v359_v20 = vpop.f32.mrf.mxu0 }
  0xe4   : > { %v367_v21 = vmul.f32 %v363_v18, %v354_v15  ;;  %v364_v22 = vmul.f32 0.044715, %v358_v19  ;;  %v360_v23 = vadd.f32 %v359_v20, %v269_v9  ;;  %v370_v24 = vmul.f32 %v366_v17, %v352_v12 }
  0xe5   : > { %v388_v47 = vmul.f32 0.5, %v358_v19 }
  0xe6   : > { %v365_v25 = vmul.f32 0.044715, %v360_v23  ;;  %v368_v26 = vmul.f32 %v364_v22, %v358_v19  ;;  %v371_v27 = vmul.f32 %v367_v21, %v354_v15  ;;  %v374_v28 = vadd.f32 %v370_v24, %v352_v12 }
  0xe7   : > { %v389_v44 = vmul.f32 0.5, %v360_v23 }
  0xe8   : > { %v369_v29 = vmul.f32 %v365_v25, %v360_v23  ;;  %v372_v30 = vmul.f32 %v368_v26, %v358_v19  ;;  %v375_v31 = vadd.f32 %v371_v27, %v354_v15  ;;  %v378_v35 = vmul.f32 0.7978846, %v374_v28 }
  0xea   : > { %v373_v32 = vmul.f32 %v369_v29, %v360_v23  ;;  %v376_v33 = vadd.f32 %v372_v30, %v358_v19  ;;  %v379_v34 = vmul.f32 0.7978846, %v375_v31 }
  0xec   : > { %v377_v36 = vadd.f32 %v373_v32, %v360_v23  ;;  %v380_v37 = vmul.f32 0.7978846, %v376_v33  ;;  %659 = vtanh.f32 %v379_v34 }
  0xee   : > { %v381_v38 = vmul.f32 0.7978846, %v377_v36  ;;  %661 = vtanh.f32 %v380_v37 }
  0xef   : > { %663 = vtanh.f32 %v378_v35 }
  0xf0   : > { %665 = vtanh.f32 %v381_v38 }
  0xf9   : > { %v660_v39 = vpop.eup %659 }
  0xfa   : > { %v391_v46 = vadd.f32 1.0, %v660_v39 }
  0xfb   : > { %v662_v40 = vpop.eup %661 }
  0xfc   : > { %v664_v41 = vpop.eup %663  ;;  %v392_v43 = vadd.f32 1.0, %v662_v40  ;;  %v395_v53 = vmul.f32 %v391_v46, %v387_v50 }
  0xfd   : > { %v666_v42 = vpop.eup %665  ;;  %v390_v48 = vadd.f32 1.0, %v664_v41 }
  0xfe   : > { %v393_v45 = vadd.f32 1.0, %v666_v42  ;;  %v396_v51 = vmul.f32 %v392_v43, %v388_v47 }
  0xff   : > { %v394_v54 = vmul.f32 %v390_v48, %v386_v52 }
 0x100   : > { %v397_v49 = vmul.f32 %v393_v45, %v389_v44 }
 0x102   : > { %435 = vmatprep.subr.mxu1 %v397_v49 }
 0x103   : > { %436 = vmatpush1.msra.mxu1 %v396_v51 }
 0x104   : > { %437 = vmatprep.subr.mxu1 %v395_v53 }
 0x105   : > { %438 = vmatpush1.msra.mxu1 %v394_v54 }
 0x106   : > { %591 = vmatmul.mubr.msk.f32.vlgmr.msra.gmra.mxu1 %vm403_vm2, %v256_v55 }
 0x1c6   : > { %v473_v57 = vpop.f32.mrf.mxu1 }
 0x1c7   : > { %v474_v58 = vadd.f32 %v473_v57, %v401_v56 }
 0x1c8   : > { %v475_v59 = vpop.f32.mrf.mxu1 }
 0x1c9   : > { %v476_v60 = vadd.f32 %v475_v59, %v401_v56  ;;  %v479_v61 = vadd.f32 %v474_v58, %v844_v4 }
 0x1cb   : > { %v480_v62 = vadd.f32 %v476_v60, %v848_v5 }
 0x1cd   : > { %v483_v63 = vcombine.low %v479_v61, %v480_v62 }
 0x1cf   : > { %485 = vst [vmem:[%s242_s12] sm:$0xff] %v483_v63 }
 0x1d0   : > { %680 = shalt.err (!%p677_p5)
}
 0x1d1   : > { %s681_s29 = scalar_lea.hbm %s501_s16, 128  ;;  %s685_s9 = scalar_lea.hbm %s910_s5, 256 }
 0x1d2   : > { %p682_p6 = scmp.ne.s32.totalorder %s501_s16, %s681_s29  ;;  %p686_p10 = scmp.lt.s32.totalorder %s501_s16, %s910_s5 }
 0x1d3   : > { %p687_p11 = scmp.lt.s32.totalorder %s685_s9, %s681_s29 }
 0x1d4   : > { %p683_p7 = pnand %p682_p6, %p818_p4 }
 0x1d5   : > { %p688_p12 = por %p687_p11, %p686_p10 }
 0x1d6   : > { %p684_p9 = pneg %p683_p7 }
 0x1d8   : > { %p689_p13 = pnand %p688_p12, %p684_p9 }
 0x1da   : > { %692 = shalt.err (!%p689_p13)
}
 0x1db   : > { %599 = dma.vmem_to_hbm [thread:$0]  (%p818_p4), %s504_s13, 128, %s501_s16, %s487_s17  }
 0x1dc PF: > { %p605_p0 = scmp.ge.s32.totalorder %s743_s23, 2  ;;  %s515_s12 = sand.u32 1, %s723_s18  }
 0x1dd   : > { %s516_s14 = scalar_lea.sflag [#allocation3], %s515_s12 }
 0x1de   : > { %p602_p1 = pnand %p605_p0, %p825_p8 }
 0x1e0   : > { %p603_p2 = pneg %p602_p1 }
 0x1e2   : > { %718 = dma.done.wait (%p603_p2), %s516_s14, 128  }
 0x1e3   : > { %720 = vsyncadd (%p603_p2), %s516_s14, 4294967168  ;;  %s18_s23 = sadd.s32 1, %s743_s23   ;;  %s913_s18 = smov %s727_s19 }
 0x1e4   : > { %p15_p3 = scmp.ge.s32.totalorder %s18_s23, 4   ;;  %s914_s19 = smov %s731_s20 }
 0x1e5   : > { %s915_s20 = smov %s831_s6  ;;  %s916_s21 = smov %s739_s22 }
 0x1e6   : > { %s917_s22 = smov %s919_s26  ;;  %17 = sbr.rel (!%p15_p3) target bundleno = 4 (0x4), region = 75 }
 0x1eb   :  { %521 = vsyncpa [#allocation3], 1 }
 0x1ec   :  { %523 = vsyncpa [#allocation3 + $0x1], 1 }

</bundles_post_ra>
